<compile_context>
chip_gen: v6e
topology: v6e:2x2x1
jax: 0.10.0
libtpu: 0.0.40
codegen_flags: <defaults>
</compile_context>

<pallas_src>
import jax
import jax.numpy as jnp
from jax import lax
from jax.experimental import pallas as pl
from jax.experimental.pallas import tpu as pltpu


def _round_up(x: int, m: int) -> int:
    return (x + m - 1) // m * m


def _pad_to(x: jax.Array, shape) -> jax.Array:
    pads = [(0, t - s) for s, t in zip(x.shape, shape)]
    if all(p == (0, 0) for p in pads):
        return x
    return jnp.pad(x, pads)


def _attention_dot_kernel(enc_ref, dec_ref, out_ref):
    # One (batch b, query-tile q) grid step.
    #   enc_ref: (S_enc, H_pad)  -- encoder outputs for batch b (resident across q)
    #   dec_ref: (TQ, H_pad)     -- decoder hidden tile
    #   out_ref: (TQ, H_pad)     -- context vectors
    enc = enc_ref[...]
    dec = dec_ref[...]

    # scores = dec @ enc^T  -> (TQ, S_enc), f32 accumulation on the MXU.
    scores = lax.dot_general(
        dec, enc, (((1,), (1,)), ((), ())),
        preferred_element_type=jnp.float32,
    )

    # Numerically-stable softmax; keep the exponentials UNnormalized and defer
    # the division to the (TQ, H) output tile (cheaper than scaling the
    # (TQ, S_enc) weights when S_enc > H).
    m = jnp.max(scores, axis=-1, keepdims=True)
    e = jnp.exp(scores - m)
    denom = jnp.sum(e, axis=-1, keepdims=True)

    # ctx = e @ enc  -> (TQ, H), then scale rows by 1/denom (EUP reciprocal,
    # essentially free in the bundle).
    ctx = jnp.dot(e.astype(enc.dtype), enc, preferred_element_type=jnp.float32)
    ctx = ctx * pl.reciprocal(denom, approx=True)
    out_ref[...] = ctx.astype(out_ref.dtype)


def attention_dot(output_enc: jax.Array, hidden_dec: jax.Array, *, tq_max: int = 256) -> jax.Array:
    """Pallas implementation of AttentionDot.forward.

    output_enc: (B, S_enc, H)
    hidden_dec: (B, S_dec, H)
    returns ctx_vec: (B, S_dec, H)
    """
    B, S_enc, H = output_enc.shape
    B2, S_dec, H2 = hidden_dec.shape
    assert B == B2 and H == H2

    out_dtype = hidden_dec.dtype
    itemsize = jnp.dtype(output_enc.dtype).itemsize

    # Lane-dense hidden dim (output last dim): pad to a multiple of 128.
    H_pad = _round_up(H, 128)
    # Query tile: multiple of 8 sublanes, capped at tq_max (tq_max % 8 == 0).
    TQ = min(tq_max, _round_up(S_dec, 8))
    S_dec_pad = _round_up(S_dec, TQ)
    n_q = S_dec_pad // TQ

    # Zero padding is exact: padded H columns contribute nothing to the scores
    # and produce zero output columns; padded decoder rows are sliced off.
    enc_p = _pad_to(output_enc, (B, S_enc, H_pad))
    dec_p = _pad_to(hidden_dec, (B, S_dec_pad, H_pad))

    # Per-step VMEM: double-buffered blocks + f32 scores/e intermediates.
    block_bytes = (S_enc * H_pad + 2 * TQ * H_pad) * itemsize
    scratch_bytes = 2 * TQ * S_enc * 4 + TQ * H_pad * 4
    vmem_limit = int(max(2 * block_bytes + scratch_bytes + (4 << 20), 32 << 20))

    cost = pl.CostEstimate(
        flops=4 * B * S_dec_pad * S_enc * H_pad,           # two matmuls
        transcendentals=B * S_dec_pad * S_enc,             # exp
        bytes_accessed=(enc_p.size + dec_p.size) * itemsize
        + B * S_dec_pad * H_pad * jnp.dtype(out_dtype).itemsize,
    )

    out = pl.pallas_call(
        _attention_dot_kernel,
        out_shape=jax.ShapeDtypeStruct((B, S_dec_pad, H_pad), out_dtype),
        grid_spec=pltpu.PrefetchScalarGridSpec(
            num_scalar_prefetch=0,
            # q is the INNER axis so the enc block index (b, 0, 0) is unchanged
            # across q steps and the encoder tile stays resident in VMEM.
            grid=(B, n_q),
            in_specs=[
                pl.BlockSpec((pl.Squeezed(), S_enc, H_pad), lambda b, q: (b, 0, 0)),
                pl.BlockSpec((pl.Squeezed(), TQ, H_pad), lambda b, q: (b, q, 0)),
            ],
            out_specs=pl.BlockSpec((pl.Squeezed(), TQ, H_pad), lambda b, q: (b, q, 0)),
        ),
        compiler_params=pltpu.CompilerParams(
            # Both axes independent; 'parallel' lets megacore (v7x 2 TCs) shard
            # over batch AND query tiles even when B is small.
            dimension_semantics=("parallel", "parallel"),
            vmem_limit_bytes=vmem_limit,
        ),
        cost_estimate=cost,
    )(enc_p, dec_p)

    return out[:, :S_dec, :H]


def _reference(output_enc, hidden_dec):
    scores = jnp.einsum("bqh,bkh->bqk", hidden_dec, output_enc)
    attn = jax.nn.softmax(scores, axis=-1)
    return jnp.einsum("bqk,bkh->bqh", attn, output_enc)


if __name__ == "__main__":
    # Small, deterministic example shapes.
    B, S_enc, S_dec, H = 2, 8, 8, 32
    key = jax.random.PRNGKey(0)
    k_enc, k_dec = jax.random.split(key)
    output_enc = jax.random.normal(k_enc, (B, S_enc, H), dtype=jnp.float32)
    hidden_dec = jax.random.normal(k_dec, (B, S_dec, H), dtype=jnp.float32)

    ctx_vec = jax.block_until_ready(attention_dot(output_enc, hidden_dec))

    ref = _reference(output_enc, hidden_dec)
    assert ctx_vec.shape == (B, S_dec, H)
    # Slightly looser tolerance than pure-f32 XLA: softmax denom uses the EUP
    # approximate reciprocal (deferred normalization).
    assert jnp.allclose(ctx_vec, ref, atol=1e-2, rtol=1e-2)

    print("KERNEL_OK")
</pallas_src>

<mosaic_0001>
module attributes {stable_mosaic.version = 11 : i64} {
  func.func @_attention_dot_kernel(%arg0: i32, %arg1: i32, %arg2: memref<1x8x128xf32, #tpu.memory_space<vmem>>, %arg3: memref<1x8x128xf32, #tpu.memory_space<vmem>>, %arg4: memref<1x8x128xf32, #tpu.memory_space<vmem>>) attributes {dimension_semantics = [#tpu.dimension_semantics<parallel>, #tpu.dimension_semantics<parallel>], iteration_bounds = array<i64: 2, 1>, scalar_prefetch = 0 : i64, scratch_operands = 0 : i64, tpu.core_type = #tpu.core_type<tc>, window_params = [{transform_indices = @transform_0, window_bounds = array<i64: 1, 8, 128>}, {transform_indices = @transform_1, window_bounds = array<i64: 1, 8, 128>}, {transform_indices = @transform_2, window_bounds = array<i64: 1, 8, 128>}]} {
    %c0 = arith.constant 0 : index
    %c0_0 = arith.constant 0 : index
    %c0_1 = arith.constant 0 : index
    %0 = vector.load %arg2[%c0, %c0_0, %c0_1] : memref<1x8x128xf32, #tpu.memory_space<vmem>>, vector<1x8x128xf32>
    %1 = vector.shape_cast %0 : vector<1x8x128xf32> to vector<8x128xf32>
    %c0_2 = arith.constant 0 : index
    %c0_3 = arith.constant 0 : index
    %c0_4 = arith.constant 0 : index
    %2 = vector.load %arg3[%c0_2, %c0_3, %c0_4] : memref<1x8x128xf32, #tpu.memory_space<vmem>>, vector<1x8x128xf32>
    %3 = vector.shape_cast %2 : vector<1x8x128xf32> to vector<8x128xf32>
    %cst = arith.constant dense<0.000000e+00> : vector<8x8xf32>
    %4 = tpu.matmul %3, %1, %cst {dimension_numbers = #tpu.dot_dimension_numbers<[1], [1], [0], [0], [0, 0, 1, 0], [], []>} : vector<8x128xf32>, vector<8x128xf32>, vector<8x8xf32> -> vector<8x8xf32>
    %cst_5 = arith.constant dense<0xFF800000> : vector<8xf32>
    %5 = vector.multi_reduction <maximumf>, %4, %cst_5 [1] : vector<8x8xf32> to vector<8xf32>
    %6 = vector.shape_cast %5 : vector<8xf32> to vector<8x1xf32>
    %7 = vector.broadcast %6 : vector<8x1xf32> to vector<8x8xf32>
    %8 = arith.subf %4, %7 : vector<8x8xf32>
    %9 = math.exp %8 : vector<8x8xf32>
    %cst_6 = arith.constant dense<0.000000e+00> : vector<8xf32>
    %10 = vector.multi_reduction <add>, %9, %cst_6 [1] : vector<8x8xf32> to vector<8xf32>
    %11 = vector.shape_cast %10 : vector<8xf32> to vector<8x1xf32>
    %cst_7 = arith.constant dense<0.000000e+00> : vector<8x128xf32>
    %12 = tpu.matmul %9, %1, %cst_7 {dimension_numbers = #tpu.dot_dimension_numbers<[1], [0], [0], [1], [0, 0, 1, 1], [], []>} : vector<8x8xf32>, vector<8x128xf32>, vector<8x128xf32> -> vector<8x128xf32>
    %13 = tpu.reciprocal %11 {approx = true} : vector<8x1xf32> -> vector<8x1xf32>
    %14 = vector.broadcast %13 : vector<8x1xf32> to vector<8x128xf32>
    %15 = arith.mulf %12, %14 : vector<8x128xf32>
    %c0_8 = arith.constant 0 : index
    %c0_9 = arith.constant 0 : index
    %c0_10 = arith.constant 0 : index
    %16 = vector.load %arg4[%c0_8, %c0_9, %c0_10] : memref<1x8x128xf32, #tpu.memory_space<vmem>>, vector<1x8x128xf32>
    %17 = vector.shape_cast %16 : vector<1x8x128xf32> to vector<8x128xf32>
    %18 = vector.shape_cast %15 : vector<8x128xf32> to vector<1x8x128xf32>
    tpu.vector_store %arg4[%c0_8, %c0_9, %c0_10], %18 {strides = array<i32>} : memref<1x8x128xf32, #tpu.memory_space<vmem>>, vector<1x8x128xf32>,
    return
  }
  func.func @transform_0(%arg0: i32, %arg1: i32) -> (i32, i32, i32) {
    %c0_i32 = arith.constant 0 : i32
    %c0_i32_0 = arith.constant 0 : i32
    %c0_i32_1 = arith.constant 0 : i32
    return %arg0, %c0_i32, %c0_i32_0 : i32, i32, i32
  }
  func.func @transform_1(%arg0: i32, %arg1: i32) -> (i32, i32, i32) {
    %c0_i32 = arith.constant 0 : i32
    %c0_i32_0 = arith.constant 0 : i32
    return %arg0, %arg1, %c0_i32 : i32, i32, i32
  }
  func.func @transform_2(%arg0: i32, %arg1: i32) -> (i32, i32, i32) {
    %c0_i32 = arith.constant 0 : i32
    %c0_i32_0 = arith.constant 0 : i32
    return %arg0, %arg1, %c0_i32 : i32, i32, i32
  }
}

</mosaic_0001>

<bundles_post_ra>
// kernel: tpu_custom_call.1
= control target key start
LH: loop header
LB: loop body
LE: loop exit
PB: predicated region body
PF: predicated region fallthrough
CT: control target
= control target key end

     0   :  { %7 = vsyncpa [#allocation3], 0  ;;  %s927_s0 = inlined_call_operand.hbm [shape: f32[2,8,128], index: 0, kind: input, shape index: {}]   ;;  %s928_s1 = inlined_call_operand.hbm [shape: f32[2,8,128], index: 1, kind: input, shape index: {}]   ;;  %s929_s2 = inlined_call_operand.hbm [shape: f32[2,8,128], index: 2, kind: output, shape index: {}]  }
   0x1   :  { %9 = vsyncpa [#allocation3 + $0x1], 0 }
   0x2   :  { %10 = vsyncpa [#allocation6], 0 }
   0x3   :  { %12 = vsyncpa [#allocation6 + $0x1], 0 }
   0x4   :  { %13 = vsyncpa [#allocation4], 0 }
   0x5   :  { %15 = vsyncpa [#allocation4 + $0x1], 0  ;;  %s755_s9 = smov 0   ;;  %s757_s10 = smov 0  }
   0x6   :  { %s759_s11 = smov 0   ;;  %s761_s12 = smov 0  }
   0x7   :  { %s763_s13 = smov 0   ;;  %s765_s14 = smov 0  }
   0x8 LB: > { %s489_s15 = sadd.s32 4294967295, %s733_s14   ;;  %s490_s16 = sadd.s32 4294967294, %s733_s14   ;;  %s733_s14 = sphi %s765_s14, %s21_s14   ;;  %s729_s13 = sphi %s763_s13, %s941_s13   ;;  %s725_s12 = sphi %s761_s12, %s940_s12   ;;  %s721_s11 = sphi %s759_s11, %s939_s11   ;;  %s717_s10 = sphi %s757_s10, %s938_s10   ;;  %s713_s9 = sphi %s755_s9, %s937_s9  }
   0x9   : > { %s33_s17 = sadd.s32 1, %s729_s13  ;;  %s40_s18 = sadd.s32 1, %s721_s11 }
   0xa   : > { %p35_p0 = scmp.ge.s32.totalorder %s33_s17, 2  ;;  %p47_p1 = scmp.ne.s32.totalorder %s721_s11, %s717_s10 }
   0xb   : > { %p48_p2 = scmp.eq.s32.totalorder %s733_s14, 0  ;;  %p53_p3 = scmp.ne.s32.totalorder %s717_s10, %s713_s9 }
   0xc   : > { %s943_s17 = smov (%p35_p0, %s33_s17), 0  ;;  %p54_p5 = scmp.eq.s32.totalorder %s489_s15, 0 }
   0xd   : > { %p796_p4 = por %p48_p2, %p47_p1  ;;  %s37_s20 = ssub.s32 %s729_s13, %s943_s17 }
   0xe   : > { %p107_p6 = scmp.eq.s32.totalorder %s489_s15, 1  ;;  %p38_p7 = scmp.eq.s32.totalorder %s37_s20, 0 }
   0xf   : > { %p802_p8 = por %p54_p5, %p53_p3  ;;  %p113_p10 = scmp.eq.s32.totalorder %s490_s16, 1 }
  0x10   : > { %p806_p9 = por %p107_p6, %p47_p1  ;;  %p537_p13 = scmp.lt.s32.totalorder %s733_s14, 2 }
  0x11   : > { %s811_s23 = scalar_select %p38_p7, %s721_s11, %s40_s18  }
  0x12   : > { %p813_p11 = por %p113_p10, %p53_p3  ;;  %s820_s25 = sand.u32 1, %s721_s11  }
  0x13   : > { %s493_s26 = sshll.u32 %s820_s25, 3  ;;  %s494_s27 = sshll.u32 %s729_s13, 7 }
  0x14   : > { %s142_s30 = scalar_lea.hbm %s927_s0, %s494_s27  ;;  %s137_s3 = scalar_lea.vmem [#allocation2], %s493_s26 }
  0x15   : > { %s144_s4 = sshll.u32 %s137_s3, 4  ;;  %p829_p0 = pnand %p537_p13, %p796_p4  ;;  %s145_s4 = int_to_ptr.vmem [resolvable:$true] %s144_s4 }
  0x16   : > { %p497_p1 = scmp.ge.s32.totalorder %s733_s14, 1  ;;  %p168_p2 = scmp.lt.s32.totalorder %s733_s14, 3 }
  0x17   : > { %s134_s6 = scalar_lea.sflag [#allocation3], %s820_s25  ;;  %p595_p3 = pneg %p829_p0 }
  0x18   : > { %s606_s7 = scalar_lea.vmem %s145_s4, 128  ;;  %s735_s8 = smov [#allocation2]  }
  0x19   : > { %p607_p5 = scmp.ne.s32.totalorder %s145_s4, %s606_s7  ;;  %s611_s15 = sshll.u32 %s735_s8, 4  ;;  %s612_s15 = int_to_ptr.vmem [resolvable:$false] %s611_s15 }
  0x1a   : > { %s613_s16 = scalar_lea.vmem %s612_s15, 256  ;;  %p614_p4 = scmp.lt.s32.totalorder %s145_s4, %s612_s15 }
  0x1b   : > { %p609_p6 = pnand %p607_p5, %p595_p3  ;;  %p615_p10 = scmp.lt.s32.totalorder %s613_s16, %s606_s7 }
  0x1d   : > { %p610_p7 = pneg %p609_p6  ;;  %p616_p13 = por %p615_p10, %p614_p4 }
  0x1f   : > { %p617_p12 = pnand %p616_p13, %p610_p7 }
  0x21   : > { %620 = shalt.err (!%p617_p12)
}
  0x22   : > { %529 = dma.hbm_to_vmem [thread:$0]  (!%p829_p0), %s142_s30, 128, %s145_s4, %s134_s6  }
  0x23   : > { %p847_p5 = pnand %p497_p1, %p168_p2  ;;  %s161_s28 = scalar_lea.hbm %s928_s1, %s494_s27 }
  0x24   : > { %s155_s29 = scalar_lea.vmem [#allocation5], %s493_s26  ;;  %s152_s7 = scalar_lea.sflag [#allocation6], %s820_s25 }
  0x25   : > { %s163_s3 = sshll.u32 %s155_s29, 4  ;;  %s736_s30 = smov [#allocation5]   ;;  %s164_s3 = int_to_ptr.vmem [resolvable:$true] %s163_s3 }
  0x26   : > { %s634_s8 = scalar_lea.vmem %s164_s3, 128  ;;  %s639_s4 = sshll.u32 %s736_s30, 4  ;;  %s640_s4 = int_to_ptr.vmem [resolvable:$false] %s639_s4 }
  0x27   : > { %p635_p12 = scmp.ne.s32.totalorder %s164_s3, %s634_s8  ;;  %s641_s6 = scalar_lea.vmem %s640_s4, 256 }
  0x28   : > { %p642_p1 = scmp.lt.s32.totalorder %s164_s3, %s640_s4  ;;  %p643_p2 = scmp.lt.s32.totalorder %s641_s6, %s634_s8 }
  0x29   : > { %p637_p6 = pnand %p635_p12, %p595_p3 }
  0x2a   : > { %p644_p4 = por %p643_p2, %p642_p1 }
  0x2b   : > { %p638_p7 = pneg %p637_p6 }
  0x2d   : > { %p645_p10 = pnand %p644_p4, %p638_p7 }
  0x2f   : > { %648 = shalt.err (!%p645_p10)
}
  0x30   : > { %532 = dma.hbm_to_vmem [thread:$0]  (!%p829_p0), %s161_s28, 128, %s164_s3, %s152_s7  }
  0x31   : > { %172 = sbr.rel (%p847_p5) target bundleno = 621 (0x26d), region = 28  ;;  %s863_s25 = sand.u32 (!%p847_p5), 1, %s717_s10  }
  0x32   : > { %s866_s26 = sshll.u32 (!%p847_p5), %s863_s25, 3  ;;  %s175_s27 = scalar_lea.sflag (!%p847_p5), [#allocation3], %s863_s25 }
  0x33   : > { %s178_s15 = scalar_lea.vmem (!%p847_p5), [#allocation2], %s866_s26 }
  0x36   : > { %700 = dma.done.wait (%p802_p8), %s175_s27, 128  }
  0x37   : > { %702 = vsyncadd (%p802_p8), %s175_s27, 4294967168  ;;  %s184_s5 = scalar_lea.sflag [#allocation6], %s863_s25  ;;  %s187_s16 = scalar_lea.vmem [#allocation5], %s866_s26 }
  0x38   : > { %704 = dma.done.wait (%p802_p8), %s184_s5, 128  }
  0x39   : > { %706 = vsyncadd (%p802_p8), %s184_s5, 4294967168  ;;  %v737_v0 = vmov 0.0   ;;  %vm738_vm0 = vmmov 0   ;;  %v213_v1 = vld [vmem:[%s178_s15] sm:$0xff]  ;;  %v214_v2 = vld [vmem:[%s187_s16] sm:$0xff]  ;;  %vm285_vm1 = vcmask 64512  }
  0x3a   : > { %510 = vmatprep.subr.mxu0 %v737_v0  ;;  %512 = vmatprep.mubr.msk.f32.mxu0 %vm738_vm0, %v737_v0  ;;  %s503_s21 = sshll.u32 %s725_s12, 7  ;;  %s212_s18 = scalar_lea.vmem [#allocation7], %s866_s26 }
  0x3b   : > { %515 = vmatprep.subr.mxu1 %v737_v0  ;;  %517 = vmatprep.mubr.msk.f32.mxu1 %vm738_vm0, %v737_v0  ;;  %s386_s19 = sshll.u32 %s212_s18, 4  ;;  %s885_s29 = scalar_lea.hbm %s929_s2, %s503_s21  ;;  %s387_s19 = int_to_ptr.vmem [resolvable:$true] %s386_s19 }
  0x3c   : > { %511 = vmatpush3.xpose.msra.mxu0 %v213_v1  ;;  %516 = vmatpush3.msra.mxu1 %v213_v1  ;;  %s372_s3 = scalar_lea.sflag [#allocation4], %s863_s25  ;;  %s649_s7 = scalar_lea.vmem %s387_s19, 128 }
  0x3d   : > { %p650_p8 = scmp.ne.s32.totalorder %s387_s19, %s649_s7  ;;  %s739_s12 = smov [#allocation7]  }
  0x3e   : > { %s653_s8 = sshll.u32 %s739_s12, 4  ;;  %s654_s8 = int_to_ptr.vmem [resolvable:$false] %s653_s8 }
  0x3f   : > { %513 = vmatmul.mubr.f32.vlgmr.msra.gmra.mxu0 %v214_v2  ;;  %p651_p0 = pnand %p650_p8, %p806_p9  ;;  %s655_s30 = scalar_lea.vmem %s654_s8, 256 }
  0x40   : > { %p656_p13 = scmp.lt.s32.totalorder %s387_s19, %s654_s8  ;;  %p657_p5 = scmp.lt.s32.totalorder %s655_s30, %s649_s7 }
  0x41   : > { %p652_p3 = pneg %p651_p0 }
  0x42   : > { %p658_p12 = por %p657_p5, %p656_p13 }
  0x44   : > { %p659_p6 = pnand %p658_p12, %p652_p3 }
  0xff   : > { %v281_v3 = vpop.f32.mrf.mxu0 }
 0x100   : > { %v286_v4 = vsel %vm285_vm1, %v281_v3, -inf }
 0x101   : > { %287 = vmax.xlane.f32.xlu0 %v286_v4  ;;  %v514_v5 = vpop.f32.mrf.mxu0 }
 0x18a   : > { %v288_v6 = vpop.xlane.xlu0 %287 }
 0x18b   : > { %v289_v7 = vsub.f32 %v281_v3, %v288_v6 }
 0x18d   : > { %v290_v8 = vmul.f32 1.442695, %v289_v7 }
 0x18f   : > { %589 = vpow2.f32 %v290_v8 }
 0x19c   : > { %v590_v9 = vpop.eup %589 }
 0x19d   : > { %518 = vmatmul.mubr.msk.f32.vlgmr.msra.gmra.mxu1 %vm285_vm1, %v590_v9  ;;  %v292_v10 = vsel %vm285_vm1, %v590_v9, 0.0 }
 0x19e   : > { %293 = vadd.xlane.f32.xlu0 %v292_v10 }
 0x227   : > { %v294_v11 = vpop.xlane.xlu0 %293 }
 0x228   : > { %591 = vrcp.f32 %v294_v11 }
 0x235   : > { %v592_v12 = vpop.eup %591 }
 0x25d   : > { %v364_v13 = vpop.f32.mrf.mxu1 }
 0x25e   : > { %v369_v14 = vmul.f32 %v592_v12, %v364_v13 }
 0x25f   : > { %v519_v15 = vpop.f32.mrf.mxu1 }
 0x260   : > { %370 = vst [vmem:[%s212_s18] sm:$0xff] %v369_v14 }
 0x261   : > { %662 = shalt.err (!%p659_p6)
}
 0x262   : > { %s663_s4 = scalar_lea.hbm %s885_s29, 128  ;;  %s667_s26 = scalar_lea.hbm %s929_s2, 256 }
 0x263   : > { %p664_p7 = scmp.ne.s32.totalorder %s885_s29, %s663_s4  ;;  %p668_p4 = scmp.lt.s32.totalorder %s885_s29, %s929_s2 }
 0x264   : > { %p669_p10 = scmp.lt.s32.totalorder %s667_s26, %s663_s4 }
 0x265   : > { %p665_p1 = pnand %p664_p7, %p806_p9 }
 0x266   : > { %p670_p8 = por %p669_p10, %p668_p4 }
 0x267   : > { %p666_p2 = pneg %p665_p1 }
 0x269   : > { %p671_p0 = pnand %p670_p8, %p666_p2 }
 0x26b   : > { %674 = shalt.err (!%p671_p0)
}
 0x26c   : > { %524 = dma.vmem_to_hbm [thread:$0]  (%p806_p9), %s387_s19, 128, %s885_s29, %s372_s3  }
 0x26d PF: > { %s398_s5 = sand.u32 1, %s713_s9   ;;  %p936_p3 = scmp.ge.s32.totalorder %s733_s14, 2 }
 0x26e   : > { %s399_s16 = scalar_lea.sflag [#allocation4], %s398_s5 }
 0x26f   : > { %p534_p13 = pnand %p936_p3, %p813_p11 }
 0x271   : > { %p535_p5 = pneg %p534_p13 }
 0x273   : > { %708 = dma.done.wait (%p535_p5), %s399_s16, 128  }
 0x274   : > { %710 = vsyncadd (%p535_p5), %s399_s16, 4294967168  ;;  %s21_s14 = sadd.s32 1, %s733_s14   ;;  %s937_s9 = smov %s717_s10 }
 0x275   : > { %p18_p12 = scmp.ge.s32.totalorder %s21_s14, 4   ;;  %s938_s10 = smov %s721_s11 }
 0x276   : > { %s939_s11 = smov %s811_s23  ;;  %s940_s12 = smov %s729_s13 }
 0x277   : > { %s941_s13 = smov %s943_s17  ;;  %20 = sbr.rel (!%p18_p12) target bundleno = 8 (0x8), region = 86 }
 0x27c   :  { %404 = vsyncpa [#allocation3], 1 }
 0x27d   :  { %406 = vsyncpa [#allocation3 + $0x1], 1 }
 0x27e   :  { %407 = vsyncpa [#allocation6], 1 }
 0x27f   :  { %409 = vsyncpa [#allocation6 + $0x1], 1 }
 0x280   :  { %410 = vsyncpa [#allocation4], 1 }
 0x281   :  { %412 = vsyncpa [#allocation4 + $0x1], 1 }

</bundles_post_ra>
